<compile_context>
chip_gen: v6e
topology: v6e:2x2x1
jax: 0.10.0
libtpu: 0.0.40
codegen_flags: <defaults>
</compile_context>

<pallas_src>
import functools

import jax
import jax.numpy as jnp
from jax.experimental import pallas as pl
from jax.experimental.pallas import tpu as pltpu

LN_EPS = 1e-5   # torch.nn.LayerNorm default


def _conv_block_kernel(x_ref, halo_ref, keep_ref, w_ref, b_ref, g_ref, bt_ref,
                       o_ref, *, K, pad_l, pad_r, masked, compute_dtype):
    """One (batch, L-tile) per grid step.  NCL layout: length on the lane axis.

    x_ref    : (1, Cin, tL)            raw (unmasked) input tile
    halo_ref : (1, 1, Cin, max(K-1,1)) pre-masked halo columns [left | right]
    keep_ref : (1, 1, tL)              1.0 valid / 0.0 padded position
    w_ref    : (Cout, K*Cin)           conv weight, contraction ordered (k, cin)
    b_ref    : (Cout, 1)               conv bias
    g_ref    : (Cout, 1)               LayerNorm weight
    bt_ref   : (Cout, 1)               LayerNorm bias
    o_ref    : (1, Cout, tL)           output tile (lane-dense stores)
    """
    tL = x_ref.shape[2]
    Cout = o_ref.shape[1]

    xm = x_ref[0]                          # (Cin, tL)
    if masked:
        keep = keep_ref[0]                 # (1, tL)
        xm = xm * keep                     # masked_fill before conv

    if K > 1:
        halo = halo_ref[0, 0]              # (Cin, K-1), already masked / zeroed
        xp = jnp.concatenate(
            [halo[:, :pad_l], xm, halo[:, pad_l:pad_l + pad_r]], axis=1)
    else:
        xp = xm                            # (Cin, tL + K - 1)

    # im2col once in VMEM: rows ordered (k, cin) to match w_ref's columns.
    win = jnp.concatenate([xp[:, k:k + tL] for k in range(K)], axis=0)  # (K*Cin, tL)

    w = w_ref[...]
    if compute_dtype is not None:
        w = w.astype(compute_dtype)
        win = win.astype(compute_dtype)
    acc = jnp.dot(w, win, preferred_element_type=jnp.float32)  # (Cout, tL), one MXU pass
    acc = acc + b_ref[...]

    if masked:
        acc = acc * keep                   # masked_fill after conv
    acc = jnp.maximum(acc, 0.0)            # ReLU

    # LayerNorm over channels (sublane axis), centered variance.
    inv_c = jnp.float32(1.0 / Cout)
    mean = jnp.sum(acc, axis=0, keepdims=True) * inv_c
    diff = acc - mean
    var = jnp.sum(diff * diff, axis=0, keepdims=True) * inv_c
    xn = diff * jax.lax.rsqrt(var + LN_EPS)
    xn = xn * g_ref[...] + bt_ref[...]

    if masked:
        xn = xn * keep                     # masked_fill after norm
    # TODO(synk): Dropout with p > 0 (training) not implemented; p=0 / eval is identity.
    o_ref[0] = xn.astype(o_ref.dtype)


def _pick_tile_l(L, target):
    """Largest multiple of 128 that divides L and is <= target; else whole L."""
    if L % 128 != 0:
        return L
    cands = [t for t in range(128, min(target, L) + 1, 128) if L % t == 0]
    return max(cands) if cands else L


def conv_block_forward(x, padding_mask, weight, bias, gamma, beta, kernel_size,
                       *, tile_l=512, compute_dtype=None):
    """ConvBlock forward.  x: (B, Cin, L) NCL (like PyTorch); returns (B, Cout, L)."""
    B, Cin, L = x.shape
    Cout = weight.shape[0]
    K = kernel_size
    pad_l = (K - 1) // 2
    pad_r = K - 1 - pad_l

    masked = padding_mask is not None
    if masked:
        if padding_mask.ndim == 1:
            padding_mask = jnp.broadcast_to(padding_mask[None, :], (B, L))
        keep = jnp.where(padding_mask, 0.0, 1.0).astype(x.dtype)      # (B, L)
    else:
        keep = jnp.ones((B, L), dtype=x.dtype)                        # unused in kernel

    tL = _pick_tile_l(L, tile_l)
    nL = L // tL

    # Tiny per-tile halo columns (masked, zero outside [0, L)).  Only the K-1
    # boundary columns per tile are gathered; the full masked/padded copy of x
    # is never materialized.
    Hw = max(K - 1, 1)
    if K > 1:
        pos_l = jnp.arange(nL)[:, None] * tL - pad_l + jnp.arange(pad_l)[None, :]
        pos_r = (jnp.arange(nL)[:, None] + 1) * tL + jnp.arange(pad_r)[None, :]
        pos = jnp.concatenate([pos_l, pos_r], axis=1).reshape(-1)     # (nL*(K-1),)
        valid = ((pos >= 0) & (pos < L)).astype(x.dtype)
        pos_c = jnp.clip(pos, 0, L - 1)
        halo_vals = jnp.take(x, pos_c, axis=2)                        # (B, Cin, nL*(K-1))
        halo_keep = jnp.take(keep, pos_c, axis=1) if masked else 1.0  # (B, nL*(K-1))
        scale = (halo_keep * valid[None, :]) if masked else valid[None, :]
        halos = halo_vals * scale[:, None, :]
        halos = halos.reshape(B, Cin, nL, K - 1).transpose(0, 2, 1, 3)  # (B,nL,Cin,K-1)
    else:
        halos = jnp.zeros((B, nL, Cin, Hw), dtype=x.dtype)

    # Weight flattened so the contraction dim is ordered (k, cin).
    w_flat = jnp.transpose(weight, (0, 2, 1)).reshape(Cout, K * Cin)  # (Cout, K*Cin)
    bias2 = bias.reshape(Cout, 1)
    gamma2 = gamma.reshape(Cout, 1)
    beta2 = beta.reshape(Cout, 1)
    keep3 = keep[:, None, :]                                          # (B, 1, L)

    itemsize = jnp.dtype(x.dtype).itemsize
    cost = pl.CostEstimate(
        flops=2 * B * L * K * Cin * Cout,
        transcendentals=B * L,
        bytes_accessed=int(itemsize * (x.size + keep3.size + halos.size
                                       + w_flat.size + 3 * Cout + B * Cout * L)))

    # VMEM budget: double-buffered blocks + f32 temporaries; cap at 64 MiB (v7x).
    per_step = itemsize * (Cin * tL + Cin * Hw + tL + Cout * K * Cin
                           + 3 * Cout + Cout * tL)
    temps = 4 * (K * Cin * tL + 4 * Cout * tL + Cin * (tL + K))
    vmem_limit = int(min(64 * 2**20, max(32 * 2**20, 4 * per_step + temps)))

    kernel = functools.partial(_conv_block_kernel, K=K, pad_l=pad_l, pad_r=pad_r,
                               masked=masked, compute_dtype=compute_dtype)

    out = pl.pallas_call(
        kernel,
        out_shape=jax.ShapeDtypeStruct((B, Cout, L), x.dtype),
        grid_spec=pltpu.PrefetchScalarGridSpec(
            num_scalar_prefetch=0,
            grid=(B, nL),
            in_specs=[
                pl.BlockSpec((1, Cin, tL), lambda b, l: (b, 0, l)),
                pl.BlockSpec((1, 1, Cin, Hw), lambda b, l: (b, l, 0, 0)),
                pl.BlockSpec((1, 1, tL), lambda b, l: (b, 0, l)),
                pl.BlockSpec((Cout, K * Cin), lambda b, l: (0, 0)),
                pl.BlockSpec((Cout, 1), lambda b, l: (0, 0)),
                pl.BlockSpec((Cout, 1), lambda b, l: (0, 0)),
                pl.BlockSpec((Cout, 1), lambda b, l: (0, 0)),
            ],
            out_specs=pl.BlockSpec((1, Cout, tL), lambda b, l: (b, 0, l)),
        ),
        compiler_params=pltpu.CompilerParams(
            dimension_semantics=("parallel", "parallel"),
            vmem_limit_bytes=vmem_limit),
        cost_estimate=cost,
    )(x, halos, keep3, w_flat, bias2, gamma2, beta2)

    return out                                                        # (B, Cout, L)


def ref_forward(x, padding_mask, weight, bias, gamma, beta, K):
    """Pure-JAX reference matching the PyTorch forward."""
    B, Cin, L = x.shape
    if padding_mask is None:
        keep = jnp.ones((B, 1, L), dtype=x.dtype)
    else:
        if padding_mask.ndim == 1:
            padding_mask = jnp.broadcast_to(padding_mask[None, :], (B, L))
        keep = jnp.where(padding_mask, 0.0, 1.0).astype(x.dtype)[:, None, :]
    pad_l = (K - 1) // 2
    pad_r = K - 1 - pad_l
    xm = x * keep
    xp = jnp.pad(xm, ((0, 0), (0, 0), (pad_l, pad_r)))
    y = jax.lax.conv_general_dilated(
        xp, weight, window_strides=(1,), padding="VALID",
        dimension_numbers=("NCH", "OIH", "NCH"),
        precision=jax.lax.Precision.HIGHEST) + bias[None, :, None]
    y = y * keep
    y = jnp.maximum(y, 0.0)
    yt = jnp.transpose(y, (0, 2, 1))
    mean = yt.mean(-1, keepdims=True)
    var = ((yt - mean) ** 2).mean(-1, keepdims=True)
    yn = (yt - mean) / jnp.sqrt(var + LN_EPS) * gamma + beta
    return jnp.transpose(yn, (0, 2, 1)) * keep     # dropout p=0 -> identity


if __name__ == "__main__":
    key = jax.random.PRNGKey(0)
    kx, kw, kb, kg, kbt, kx2 = jax.random.split(key, 6)

    B, Cin, Cout, K = 2, 4, 8, 3
    weight = jax.random.normal(kw, (Cout, Cin, K), dtype=jnp.float32) * 0.2
    bias = jax.random.normal(kb, (Cout,), dtype=jnp.float32) * 0.1
    gamma = 1.0 + 0.1 * jax.random.normal(kg, (Cout,), dtype=jnp.float32)
    beta = 0.1 * jax.random.normal(kbt, (Cout,), dtype=jnp.float32)

    # Case 1: L=256 tiled into two 128-lane blocks, with a real padding mask.
    L = 256
    x = jax.random.normal(kx, (B, Cin, L), dtype=jnp.float32)
    lengths = jnp.array([L, L - 57])
    padding_mask = jnp.arange(L)[None, :] >= lengths[:, None]        # (B, L) bool

    out = conv_block_forward(x, padding_mask, weight, bias, gamma, beta, K,
                             tile_l=128)
    out = jax.block_until_ready(out)
    ref = ref_forward(x, padding_mask, weight, bias, gamma, beta, K)
    assert out.shape == (B, Cout, L)
    assert jnp.allclose(out, ref, atol=1e-4, rtol=1e-4), "mismatch vs reference (case 1)"

    # Case 2: short sequence (single tile, tL = L) and padding_mask=None path.
    L2 = 16
    x2 = jax.random.normal(kx2, (B, Cin, L2), dtype=jnp.float32)
    out2 = conv_block_forward(x2, None, weight, bias, gamma, beta, K)
    out2 = jax.block_until_ready(out2)
    ref2 = ref_forward(x2, None, weight, bias, gamma, beta, K)
    assert out2.shape == (B, Cout, L2)
    assert jnp.allclose(out2, ref2, atol=1e-4, rtol=1e-4), "mismatch vs reference (case 2)"

    print("KERNEL_OK")
</pallas_src>

<mosaic_0001>
module attributes {stable_mosaic.version = 11 : i64} {
  func.func @_conv_block_kernel(%arg0: i32, %arg1: i32, %arg2: memref<1x4x128xf32, #tpu.memory_space<vmem>>, %arg3: memref<1x1x4x2xf32, #tpu.memory_space<vmem>>, %arg4: memref<1x1x128xf32, #tpu.memory_space<vmem>>, %arg5: memref<8x12xf32, #tpu.memory_space<vmem>>, %arg6: memref<8x1xf32, #tpu.memory_space<vmem>>, %arg7: memref<8x1xf32, #tpu.memory_space<vmem>>, %arg8: memref<8x1xf32, #tpu.memory_space<vmem>>, %arg9: memref<1x8x128xf32, #tpu.memory_space<vmem>>) attributes {dimension_semantics = [#tpu.dimension_semantics<parallel>, #tpu.dimension_semantics<parallel>], iteration_bounds = array<i64: 2, 2>, scalar_prefetch = 0 : i64, scratch_operands = 0 : i64, tpu.core_type = #tpu.core_type<tc>, window_params = [{transform_indices = @transform_0, window_bounds = array<i64: 1, 4, 128>}, {transform_indices = @transform_1, window_bounds = array<i64: 1, 1, 4, 2>}, {transform_indices = @transform_2, window_bounds = array<i64: 1, 1, 128>}, {pipeline_mode = #tpu.pipeline_mode<synchronous>, transform_indices = @transform_3, window_bounds = array<i64: 8, 12>}, {pipeline_mode = #tpu.pipeline_mode<synchronous>, transform_indices = @transform_4, window_bounds = array<i64: 8, 1>}, {pipeline_mode = #tpu.pipeline_mode<synchronous>, transform_indices = @transform_5, window_bounds = array<i64: 8, 1>}, {pipeline_mode = #tpu.pipeline_mode<synchronous>, transform_indices = @transform_6, window_bounds = array<i64: 8, 1>}, {transform_indices = @transform_7, window_bounds = array<i64: 1, 8, 128>}]} {
    %c0 = arith.constant 0 : index
    %c0_0 = arith.constant 0 : index
    %c0_1 = arith.constant 0 : index
    %0 = vector.load %arg2[%c0, %c0_0, %c0_1] : memref<1x4x128xf32, #tpu.memory_space<vmem>>, vector<1x4x128xf32>
    %1 = vector.shape_cast %0 : vector<1x4x128xf32> to vector<4x128xf32>
    %c0_2 = arith.constant 0 : index
    %c0_3 = arith.constant 0 : index
    %c0_4 = arith.constant 0 : index
    %2 = vector.load %arg4[%c0_2, %c0_3, %c0_4] : memref<1x1x128xf32, #tpu.memory_space<vmem>>, vector<1x1x128xf32>
    %3 = vector.shape_cast %2 : vector<1x1x128xf32> to vector<1x128xf32>
    %4 = vector.broadcast %3 : vector<1x128xf32> to vector<4x128xf32>
    %5 = arith.mulf %1, %4 : vector<4x128xf32>
    %c0_5 = arith.constant 0 : index
    %c0_6 = arith.constant 0 : index
    %c0_7 = arith.constant 0 : index
    %c0_8 = arith.constant 0 : index
    %6 = vector.load %arg3[%c0_5, %c0_6, %c0_7, %c0_8] : memref<1x1x4x2xf32, #tpu.memory_space<vmem>>, vector<1x1x4x2xf32>
    %7 = vector.shape_cast %6 : vector<1x1x4x2xf32> to vector<4x2xf32>
    %8 = vector.extract_strided_slice %7 {offsets = [0, 0], sizes = [4, 1], strides = [1, 1]} : vector<4x2xf32> to vector<4x1xf32>
    %9 = vector.extract_strided_slice %7 {offsets = [0, 1], sizes = [4, 1], strides = [1, 1]} : vector<4x2xf32> to vector<4x1xf32>
    %10 = tpu.concatenate %8, %5, %9 in 1 : vector<4x1xf32>, vector<4x128xf32>, vector<4x1xf32> -> vector<4x130xf32>
    %11 = vector.extract_strided_slice %10 {offsets = [0, 0], sizes = [4, 128], strides = [1, 1]} : vector<4x130xf32> to vector<4x128xf32>
    %12 = vector.extract_strided_slice %10 {offsets = [0, 1], sizes = [4, 128], strides = [1, 1]} : vector<4x130xf32> to vector<4x128xf32>
    %13 = vector.extract_strided_slice %10 {offsets = [0, 2], sizes = [4, 128], strides = [1, 1]} : vector<4x130xf32> to vector<4x128xf32>
    %14 = tpu.concatenate %11, %12, %13 in 0 : vector<4x128xf32>, vector<4x128xf32>, vector<4x128xf32> -> vector<12x128xf32>
    %c0_9 = arith.constant 0 : index
    %c0_10 = arith.constant 0 : index
    %15 = vector.load %arg5[%c0_9, %c0_10] : memref<8x12xf32, #tpu.memory_space<vmem>>, vector<8x12xf32>
    %cst = arith.constant dense<0.000000e+00> : vector<8x128xf32>
    %16 = tpu.matmul %15, %14, %cst {dimension_numbers = #tpu.dot_dimension_numbers<[1], [0], [0], [1], [0, 0, 1, 1], [], []>} : vector<8x12xf32>, vector<12x128xf32>, vector<8x128xf32> -> vector<8x128xf32>
    %c0_11 = arith.constant 0 : index
    %c0_12 = arith.constant 0 : index
    %17 = vector.load %arg6[%c0_11, %c0_12] : memref<8x1xf32, #tpu.memory_space<vmem>>, vector<8x1xf32>
    %18 = vector.broadcast %17 : vector<8x1xf32> to vector<8x128xf32>
    %19 = arith.addf %16, %18 : vector<8x128xf32>
    %20 = vector.broadcast %3 : vector<1x128xf32> to vector<8x128xf32>
    %21 = arith.mulf %19, %20 : vector<8x128xf32>
    %cst_13 = arith.constant 0.000000e+00 : f32
    %22 = vector.broadcast %cst_13 : f32 to vector<8x128xf32>
    %23 = arith.maximumf %21, %22 : vector<8x128xf32>
    %cst_14 = arith.constant dense<0.000000e+00> : vector<128xf32>
    %24 = vector.multi_reduction <add>, %23, %cst_14 [0] : vector<8x128xf32> to vector<128xf32>
    %25 = vector.shape_cast %24 : vector<128xf32> to vector<1x128xf32>
    %cst_15 = arith.constant 1.250000e-01 : f32
    %26 = vector.broadcast %cst_15 : f32 to vector<1x128xf32>
    %27 = arith.mulf %25, %26 : vector<1x128xf32>
    %28 = vector.broadcast %27 : vector<1x128xf32> to vector<8x128xf32>
    %29 = arith.subf %23, %28 : vector<8x128xf32>
    %30 = arith.mulf %29, %29 : vector<8x128xf32>
    %cst_16 = arith.constant dense<0.000000e+00> : vector<128xf32>
    %31 = vector.multi_reduction <add>, %30, %cst_16 [0] : vector<8x128xf32> to vector<128xf32>
    %32 = vector.shape_cast %31 : vector<128xf32> to vector<1x128xf32>
    %cst_17 = arith.constant 1.250000e-01 : f32
    %33 = vector.broadcast %cst_17 : f32 to vector<1x128xf32>
    %34 = arith.mulf %32, %33 : vector<1x128xf32>
    %cst_18 = arith.constant 9.99999974E-6 : f32
    %35 = vector.broadcast %cst_18 : f32 to vector<1x128xf32>
    %36 = arith.addf %34, %35 : vector<1x128xf32>
    %37 = math.rsqrt %36 : vector<1x128xf32>
    %38 = vector.broadcast %37 : vector<1x128xf32> to vector<8x128xf32>
    %39 = arith.mulf %29, %38 : vector<8x128xf32>
    %c0_19 = arith.constant 0 : index
    %c0_20 = arith.constant 0 : index
    %40 = vector.load %arg7[%c0_19, %c0_20] : memref<8x1xf32, #tpu.memory_space<vmem>>, vector<8x1xf32>
    %41 = vector.broadcast %40 : vector<8x1xf32> to vector<8x128xf32>
    %42 = arith.mulf %39, %41 : vector<8x128xf32>
    %c0_21 = arith.constant 0 : index
    %c0_22 = arith.constant 0 : index
    %43 = vector.load %arg8[%c0_21, %c0_22] : memref<8x1xf32, #tpu.memory_space<vmem>>, vector<8x1xf32>
    %44 = vector.broadcast %43 : vector<8x1xf32> to vector<8x128xf32>
    %45 = arith.addf %42, %44 : vector<8x128xf32>
    %46 = vector.broadcast %3 : vector<1x128xf32> to vector<8x128xf32>
    %47 = arith.mulf %45, %46 : vector<8x128xf32>
    %c0_23 = arith.constant 0 : index
    %c0_24 = arith.constant 0 : index
    %c0_25 = arith.constant 0 : index
    %48 = vector.load %arg9[%c0_23, %c0_24, %c0_25] : memref<1x8x128xf32, #tpu.memory_space<vmem>>, vector<1x8x128xf32>
    %49 = vector.shape_cast %48 : vector<1x8x128xf32> to vector<8x128xf32>
    %50 = vector.shape_cast %47 : vector<8x128xf32> to vector<1x8x128xf32>
    tpu.vector_store %arg9[%c0_23, %c0_24, %c0_25], %50 {strides = array<i32>} : memref<1x8x128xf32, #tpu.memory_space<vmem>>, vector<1x8x128xf32>,
    return
  }
  func.func @transform_0(%arg0: i32, %arg1: i32) -> (i32, i32, i32) {
    %c0_i32 = arith.constant 0 : i32
    %c0_i32_0 = arith.constant 0 : i32
    return %arg0, %c0_i32, %arg1 : i32, i32, i32
  }
  func.func @transform_1(%arg0: i32, %arg1: i32) -> (i32, i32, i32, i32) {
    %c0_i32 = arith.constant 0 : i32
    %c0_i32_0 = arith.constant 0 : i32
    %c0_i32_1 = arith.constant 0 : i32
    return %arg0, %arg1, %c0_i32, %c0_i32_0 : i32, i32, i32, i32
  }
  func.func @transform_2(%arg0: i32, %arg1: i32) -> (i32, i32, i32) {
    %c0_i32 = arith.constant 0 : i32
    %c0_i32_0 = arith.constant 0 : i32
    return %arg0, %c0_i32, %arg1 : i32, i32, i32
  }
  func.func @transform_3(%arg0: i32, %arg1: i32) -> (i32, i32) {
    %c0_i32 = arith.constant 0 : i32
    %c0_i32_0 = arith.constant 0 : i32
    %c0_i32_1 = arith.constant 0 : i32
    return %c0_i32, %c0_i32_0 : i32, i32
  }
  func.func @transform_4(%arg0: i32, %arg1: i32) -> (i32, i32) {
    %c0_i32 = arith.constant 0 : i32
    %c0_i32_0 = arith.constant 0 : i32
    %c0_i32_1 = arith.constant 0 : i32
    return %c0_i32, %c0_i32_0 : i32, i32
  }
  func.func @transform_5(%arg0: i32, %arg1: i32) -> (i32, i32) {
    %c0_i32 = arith.constant 0 : i32
    %c0_i32_0 = arith.constant 0 : i32
    %c0_i32_1 = arith.constant 0 : i32
    return %c0_i32, %c0_i32_0 : i32, i32
  }
  func.func @transform_6(%arg0: i32, %arg1: i32) -> (i32, i32) {
    %c0_i32 = arith.constant 0 : i32
    %c0_i32_0 = arith.constant 0 : i32
    %c0_i32_1 = arith.constant 0 : i32
    return %c0_i32, %c0_i32_0 : i32, i32
  }
  func.func @transform_7(%arg0: i32, %arg1: i32) -> (i32, i32, i32) {
    %c0_i32 = arith.constant 0 : i32
    %c0_i32_0 = arith.constant 0 : i32
    return %arg0, %c0_i32, %arg1 : i32, i32, i32
  }
}

</mosaic_0001>

<bundles_post_ra>
// kernel: tpu_custom_call.1
= control target key start
LH: loop header
LB: loop body
LE: loop exit
PB: predicated region body
PF: predicated region fallthrough
CT: control target
= control target key end

     0   :  { %12 = vsyncpa [#allocation3], 0  ;;  %s1042_s0 = inlined_call_operand.vmem [shape: f32[2,4,256], index: 0, kind: input, shape index: {}]   ;;  %s1043_s1 = inlined_call_operand.vmem [shape: f32[2,2,4,2], index: 1, kind: input, shape index: {}]   ;;  %s1044_s2 = inlined_call_operand.vmem [shape: f32[2,1,256], index: 2, kind: input, shape index: {}]   ;;  %s1045_s3 = inlined_call_operand.vmem [shape: f32[8,12], index: 3, kind: input, shape index: {}]   ;;  %s1046_s4 = inlined_call_operand.vmem [shape: f32[8,1], index: 4, kind: input, shape index: {}]   ;;  %s1047_s5 = inlined_call_operand.vmem [shape: f32[8,1], index: 5, kind: input, shape index: {}]   ;;  %s1048_s6 = inlined_call_operand.vmem [shape: f32[8,1], index: 6, kind: input, shape index: {}]   ;;  %s1049_s7 = inlined_call_operand.hbm [shape: f32[2,8,256], index: 7, kind: output, shape index: {}]  }
   0x1   :  { %14 = vsyncpa [#allocation3 + $0x1], 0  ;;  %s895_s24 = smov 0   ;;  %s897_s25 = smov 0  }
   0x2   :  { %s899_s26 = smov 0   ;;  %s901_s27 = smov 0  }
   0x3   :  { %s903_s28 = smov 0   ;;  %s905_s29 = smov 0  }
   0x4   :  { %s907_s30 = smov 0   ;;  %s909_s8 = smov 0  }
   0x5 LB: > { %s644_s9 = sadd.s32 4294967295, %s846_s8   ;;  %s645_s10 = sadd.s32 4294967294, %s846_s8   ;;  %s846_s8 = sphi %s909_s8, %s20_s8   ;;  %s842_s30 = sphi %s907_s30, %s1064_s30   ;;  %s838_s29 = sphi %s905_s29, %s1063_s29   ;;  %s834_s28 = sphi %s903_s28, %s1062_s28   ;;  %s830_s27 = sphi %s901_s27, %s1061_s27   ;;  %s826_s26 = sphi %s899_s26, %s1060_s26   ;;  %s822_s25 = sphi %s897_s25, %s1059_s25   ;;  %s818_s24 = sphi %s895_s24, %s1058_s24  }
   0x6   : > { %s29_s11 = sadd.s32 1, %s838_s29  ;;  %s32_s12 = sadd.s32 1, %s842_s30 }
   0x7   : > { %p30_p0 = scmp.ge.s32.totalorder %s29_s11, 2  ;;  %p219_p1 = scmp.ne.s32.totalorder %s826_s26, %s822_s25 }
   0x8   : > { %p220_p2 = scmp.eq.s32.totalorder %s644_s9, 3  ;;  %p225_p5 = scmp.ne.s32.totalorder %s822_s25, %s818_s24 }
   0x9   : > { %s1066_s11 = smov (%p30_p0, %s29_s11), 0  ;;  %s1068_s12 = smov (!%p30_p0, %s32_s12), %s842_s30 }
   0xa   : > { %1052 = sst [smem:[#allocation5_spill]] %s1066_s11  ;;  %s205_s13 = ssub.s32 %s838_s29, %s1066_s11 }
   0xb   : > { %p946_p3 = por %p220_p2, %p219_p1  ;;  %p34_p4 = scmp.ge.s32.totalorder %s1068_s12, 2 }
   0xc   : > { %p226_p6 = scmp.eq.s32.totalorder %s645_s10, 3  ;;  %p648_p7 = scmp.ge.s32.totalorder %s846_s8, 1 }
   0xd   : > { %s1070_s12 = smov (%p34_p4, %s1068_s12), 0  ;;  %p288_p9 = scmp.lt.s32.totalorder %s846_s8, 5 }
   0xe   : > { %1054 = sst [smem:[#allocation6_spill]] %s1070_s12  ;;  %p955_p8 = por %p226_p6, %p225_p5 }
   0xf   : > { %s204_s16 = ssub.s32 %s842_s30, %s1070_s12  ;;  %s209_s17 = sadd.s32 1, %s826_s26 }
  0x10   : > { %s206_s18 = sor.u32 %s205_s13, %s204_s16  ;;  %p289_p10 = pnand %p648_p7, %p288_p9 }
  0x11   : > { %p207_p11 = scmp.eq.s32.totalorder %s206_s18, 0  ;;  %p338_p12 = scmp.lt.s32.totalorder (!%p289_p10), %s834_s28, 1 }
  0x12   : > { %292 = sbr.rel (%p289_p10) target bundleno = 538 (0x21a), region = 48  ;;  %p340_p13 = scmp.lt.s32.totalorder (!%p289_p10), %s830_s27, 1 }
  0x13   : > { %s964_s19 = scalar_select %p207_p11, %s826_s26, %s209_s17  }
  0x14   : > { %s848_s11 = smov (!%p289_p10), 1   ;;  %s852_s12 = smov (!%p289_p10), 126  }
  0x17   : > { %s339_s20 = scalar_select %p338_p12, %s834_s28, 1  ;;  %v849_v3 = vmov 0.0   ;;  %vm850_vm0 = vmmov 0   ;;  %v851_v4 = vmov 0   ;;  %vm375_vm1 = vcmask 7168   ;;  %v398_v11 = vld [vmem:[%s1046_s4] sm:$0xff] }
  0x18   : > { %s341_s21 = scalar_select %p340_p13, %s830_s27, 1  ;;  %666 = vmatprep.subr.mxu0 %v849_v3  ;;  %670 = vmatprep.mubr.msk.f32.mxu0 %vm850_vm0, %v849_v3  ;;  %v501_v12 = vld [vmem:[%s1047_s5] sm:$0xff]  ;;  %vm393_vm2 = vcmask 1031168   ;;  %vm395_vm3 = vcmask 1043456   ;;  %vm386_vm4 = vcmask 1039360   ;;  %vm404_vm5 = vcmask 97280  }
  0x19   : > { %s650_s22 = sshll.u32 %s339_s20, 1  ;;  %750 = vset.pattern.permute.xlu1 %v851_v4  ;;  %751 = vset.pattern.permute.xlu0 %v851_v4  ;;  %v508_v13 = vld [vmem:[%s1048_s6] sm:$0xff] }
  0x1a   : > { %s343_s23 = sadd.s32 %s650_s22, %s341_s21  ;;  %v397_v20 = vld [vmem:[%s1045_s3] sm:$0xff]  ;;  %s335_s21 = sand.u32 1, %s822_s25  }
  0x1b   : > { %s651_s9 = sshll.u32 %s343_s23, 2  ;;  %s360_s13 = scalar_lea.vmem %s1044_s2, %s343_s23 }
  0x1c   : > { %s345_s17 = scalar_lea.vmem %s1042_s0, %s651_s9  ;;  %v976_v0 = vld [vmem:[%s360_s13] ss:$0 sm:$0xff]  ;;  %s353_s22 = scalar_lea.vmem %s1043_s1, %s651_s9 }
  0x1d   : > { %v361_v1 = vld [vmem:[%s345_s17] sm:$0xf] }
  0x1e   : > { %v369_v2 = vmul.f32 %v976_v0, %v361_v1  ;;  %v370_v5 = vld [vmem:[%s353_s22] sm:$0xf]  ;;  %s649_s22 = sshll.u32 %s335_s21, 3 }
  0x1f   : > { %s337_s9 = scalar_lea.vmem [#allocation2], %s649_s22 }
  0x20   : > { %372 = vrot.lane.b32.xlu0 %v369_v2, %s848_s11  ;;  %s853_s11 = smov 127   ;;  %s533_s10 = sshll.u32 %s337_s9, 4  ;;  %s534_s10 = int_to_ptr.vmem [resolvable:$true] %s533_s10 }
  0x21   : > { %s754_s17 = scalar_lea.vmem %s534_s10, 128 }
  0x22   : > { %p755_p0 = scmp.ne.s32.totalorder %s534_s10, %s754_s17 }
  0x24   : > { %p756_p1 = pnand %p755_p0, %p946_p3 }
  0x26   : > { %p757_p2 = pneg %p756_p1 }
  0x92   : > { %v373_v6 = vpop.permute.xlu0 %372 }
  0x93   : > { %v377_v7 = vsel %vm375_vm1, %v373_v6, %v370_v5  ;;  %v376_v8 = vsel %vm375_vm1, %v370_v5, %v373_v6 }
  0x94   : > { %391 = vrot.lane.b32.xlu1 %v377_v7, %s852_s12  ;;  %389 = vrot.lane.b32.xlu0 %v376_v8, %s852_s12  ;;  %v381_v9 = vrot.slane %v377_v7, 4  ;;  %v380_v10 = vrot.slane %v376_v8, 4  ;;  %s659_s12 = sshll.u32 %s834_s28, 1  ;;  %s518_s28 = scalar_lea.sflag [#allocation3], %s335_s21 }
  0x98   : > { %384 = vrot.lane.b32.xlu0 %v381_v9, %s853_s11  ;;  %382 = vrot.lane.b32.xlu1 %v380_v10, %s853_s11  ;;  %s529_s11 = sadd.s32 %s830_s27, %s659_s12  ;;  %s854_s27 = smov [#allocation2]  }
  0x99   : > { %s660_s23 = sshll.u32 %s529_s11, 7  ;;  %s758_s20 = sshll.u32 %s854_s27, 4  ;;  %s759_s20 = int_to_ptr.vmem [resolvable:$false] %s758_s20 }
  0x9a   : > { %s531_s18 = scalar_lea.hbm %s1049_s7, %s660_s23  ;;  %s760_s22 = scalar_lea.vmem %s759_s20, 256 }
  0x9b   : > { %p761_p4 = scmp.lt.s32.totalorder %s534_s10, %s759_s20  ;;  %p762_p5 = scmp.lt.s32.totalorder %s760_s22, %s754_s17 }
  0x9c   : > { %401 = vperm.xlu1 %750, %v398_v11   ;;  %504 = vperm.xlu0 %751, %v501_v12  }
  0x9d   : > { %p763_p6 = por %p762_p5, %p761_p4 }
  0x9f   : > { %p764_p7 = pnand %p763_p6, %p757_p2 }
  0xa0   : > { %511 = vperm.xlu1 %750, %v508_v13  }
 0x106   : > { %v392_v14 = vpop.permute.xlu1 %391  ;;  %v390_v15 = vpop.permute.xlu0 %389 }
 0x107   : > { %v394_v16 = vsel %vm393_vm2, %v390_v15, %v392_v14 }
 0x108   : > { %667 = vmatpush3.msk.msra.mxu0 %vm395_vm3, %v394_v16 }
 0x109   : > { %668 = vmatprep.subr.mxu0 %v849_v3 }
 0x10a   : > { %v385_v17 = vpop.permute.xlu0 %384  ;;  %v383_v18 = vpop.permute.xlu1 %382 }
 0x10b   : > { %v387_v19 = vsel %vm386_vm4, %v383_v18, %v385_v17 }
 0x10c   : > { %v396_v21 = vsel %vm395_vm3, %v376_v8, %v387_v19 }
 0x10d   : > { %669 = vmatpush3.msra.mxu0 %v396_v21 }
 0x10e   : > { %671 = vmatmul.mubr.msk.f32.vlgmr.msra.gmra.mxu0 %vm404_vm5, %v397_v20 }
 0x117   : > { %v402_v22 = vpop.permute.xlu1 %401  ;;  %v505_v46 = vpop.permute.xlu0 %504 }
 0x11b   : > { %v512_v49 = vpop.permute.xlu1 %511 }
 0x1ce   : > { %v476_v23 = vpop.f32.mrf.mxu0 }
 0x1cf   : > { %v477_v24 = vadd.f32 %v476_v23, %v402_v22 }
 0x1d0   : > { %v672_v25 = vpop.f32.mrf.mxu0 }
 0x1d1   : > { %v480_v26 = vmul.f32 %v976_v0, %v477_v24 }
 0x1d3   : > { %v481_v27 = vmax.f32 %v480_v26, 0.0 }
 0x1d5   : > { %v482_v28 = vrot.slane %v481_v27, 4 }
 0x1d7   : > { %v483_v29 = vadd.f32 %v482_v28, %v481_v27 }
 0x1d9   : > { %v484_v30 = vrot.slane %v483_v29, 2 }
 0x1db   : > { %v485_v31 = vadd.f32 %v484_v30, %v483_v29 }
 0x1dd   : > { %v486_v32 = vrot.slane %v485_v31, 1 }
 0x1df   : > { %v487_v33 = vadd.f32 %v486_v32, %v485_v31 }
 0x1e1   : > { %v488_v34 = vmul.f32 0.125, %v487_v33 }
 0x1e3   : > { %v489_v35 = vsub.f32 %v481_v27, %v488_v34 }
 0x1e5   : > { %v490_v36 = vmul.f32 %v489_v35, %v489_v35 }
 0x1e7   : > { %v491_v37 = vrot.slane %v490_v36, 4 }
 0x1e9   : > { %v492_v38 = vadd.f32 %v491_v37, %v490_v36 }
 0x1eb   : > { %v493_v39 = vrot.slane %v492_v38, 2 }
 0x1ed   : > { %v494_v40 = vadd.f32 %v493_v39, %v492_v38 }
 0x1ef   : > { %v495_v41 = vrot.slane %v494_v40, 1 }
 0x1f1   : > { %v496_v42 = vadd.f32 %v495_v41, %v494_v40 }
 0x1f3   : > { %v497_v43 = vmul.f32 0.125, %v496_v42 }
 0x1f5   : > { %v498_v44 = vadd.f32 1e-05, %v497_v43 }
 0x1f7   : > { %752 = vrsqrt.f32 %v498_v44 }
 0x204   : > { %v753_v45 = vpop.eup %752 }
 0x205   : > { %v500_v47 = vmul.f32 %v753_v45, %v489_v35 }
 0x207   : > { %v507_v48 = vmul.f32 %v505_v46, %v500_v47 }
 0x209   : > { %v514_v50 = vadd.f32 %v512_v49, %v507_v48 }
 0x20b   : > { %v515_v51 = vmul.f32 %v976_v0, %v514_v50 }
 0x20d   : > { %516 = vst [vmem:[%s337_s9] sm:$0xff] %v515_v51 }
 0x20e   : > { %767 = shalt.err (!%p764_p7)
}
 0x20f   : > { %s768_s12 = scalar_lea.hbm %s531_s18, 128  ;;  %s772_s23 = scalar_lea.hbm %s1049_s7, 512 }
 0x210   : > { %p769_p9 = scmp.ne.s32.totalorder %s531_s18, %s768_s12  ;;  %p773_p12 = scmp.lt.s32.totalorder %s531_s18, %s1049_s7 }
 0x211   : > { %p774_p13 = scmp.lt.s32.totalorder %s772_s23, %s768_s12 }
 0x212   : > { %p770_p10 = pnand %p769_p9, %p946_p3 }
 0x213   : > { %p775_p0 = por %p774_p13, %p773_p12 }
 0x214   : > { %p771_p11 = pneg %p770_p10 }
 0x216   : > { %p776_p1 = pnand %p775_p0, %p771_p11 }
 0x218   : > { %779 = shalt.err (!%p776_p1)
}
 0x219   : > { %673 = dma.vmem_to_hbm [thread:$0]  (%p946_p3), %s534_s10, 128, %s531_s18, %s518_s28  }
 0x21a PF: > { %p679_p2 = scmp.ge.s32.totalorder %s846_s8, 2  ;;  %s545_s16 = sand.u32 1, %s818_s24  }
 0x21b   : > { %s546_s17 = scalar_lea.sflag [#allocation3], %s545_s16 }
 0x21c   : > { %p676_p4 = pnand %p679_p2, %p955_p8 }
 0x21e   : > { %p677_p5 = pneg %p676_p4 }
 0x220   : > { %813 = dma.done.wait (%p677_p5), %s546_s17, 128  }
 0x221   : > { %815 = vsyncadd (%p677_p5), %s546_s17, 4294967168  ;;  %s20_s8 = sadd.s32 1, %s846_s8   ;;  %s1056_s14 = sld [smem:[#allocation5_spill]] }
 0x222   : > { %p17_p6 = scmp.ge.s32.totalorder %s20_s8, 6   ;;  %s1057_s10 = sld [smem:[#allocation6_spill]] }
 0x223   : > { %s1058_s24 = smov %s822_s25  ;;  %s1059_s25 = smov %s826_s26 }
 0x224   : > { %s1060_s26 = smov %s964_s19  ;;  %s1061_s27 = smov %s838_s29 }
 0x225   : > { %s1062_s28 = smov %s842_s30  ;;  %19 = sbr.rel (!%p17_p6) target bundleno = 5 (0x5), region = 89 }
 0x227   : > { %s1063_s29 = smov %s1056_s14 }
 0x228   : > { %s1064_s30 = smov %s1057_s10 }
 0x22a   :  { %551 = vsyncpa [#allocation3], 1 }
 0x22b   :  { %553 = vsyncpa [#allocation3 + $0x1], 1 }

</bundles_post_ra>
